<compile_context>
chip_gen: v5e
topology: v5e:2x2
jax: 0.10.0
libtpu: 0.0.40
codegen_flags: <defaults>
</compile_context>

<pallas_src>
import jax
import jax.numpy as jnp
from jax import lax
from jax.experimental import pallas as pl
from jax.experimental.pallas import tpu as pltpu


def _dsconv_kernel(x_ref, w_ref, b_ref, o_ref):
    # x_ref: (1, C_in, L)       un-padded input slab for this batch element
    # w_ref: (C_out, 3*C_in)    fused im2col weight: w[o, k*C_in + c] = wp[o,c]*wd[c,k]
    # b_ref: (C_out, 1)         fused bias: wp @ bd + bp
    # o_ref: (1, C_out, L)
    C_in = x_ref.shape[1]
    L = x_ref.shape[2]
    x = x_ref[0]  # (C_in, L)

    # Halo for kernel_size=3, padding=1, built in-register:
    #   x_m1[c, l] = x[c, l-1]  (zero at l == 0)      -> tap k = 0
    #   x_p1[c, l] = x[c, l+1]  (zero at l == L-1)    -> tap k = 2
    # pltpu.roll is a cyclic lane rotation (XLU slot); mask the wrapped column.
    lane = lax.broadcasted_iota(jnp.int32, (C_in, L), dimension=1)
    zero = jnp.zeros_like(x)
    x_m1 = jnp.where(lane == 0, zero, pltpu.roll(x, 1, axis=1))
    x_p1 = jnp.where(lane == L - 1, zero, pltpu.roll(x, L - 1, axis=1))

    # im2col stack on the contraction axis, tap-major to match w_ref layout.
    x_stack = jnp.concatenate([x_m1, x, x_p1], axis=0)  # (3*C_in, L)

    # Fused depthwise + pointwise conv as one MXU matmul (f32 accumulation).
    out = jnp.dot(w_ref[...], x_stack, preferred_element_type=jnp.float32) + b_ref[...]
    o_ref[0] = out.astype(o_ref.dtype)


def depthwise_separable_1dconv(x, wd, bd, wp, bp):
    """x: (N, C_in, L). wd: (C_in, 3), bd: (C_in,), wp: (C_out, C_in), bp: (C_out,).

    Returns (N, C_out, L), matching
      Conv1d(C_in, C_in, k=3, pad=1, groups=C_in) -> Conv1d(C_in, C_out, k=1).
    """
    N, C_in, L = x.shape
    C_out = wp.shape[0]

    # Fold the two convs into a single matmul:
    #   out[n,o,l] = sum_{k,c} wp[o,c]*wd[c,k]*x_pad[n,c,l+k] + (wp@bd + bp)[o]
    # Parameter-sized glue (negligible HBM traffic, done once per call).
    w_eff = (wp[:, None, :] * wd.T[None, :, :]).reshape(C_out, 3 * C_in)
    b_eff = (wp @ bd + bp).reshape(C_out, 1)
    w_eff = w_eff.astype(x.dtype)
    b_eff = b_eff.astype(x.dtype)

    return pl.pallas_call(
        _dsconv_kernel,
        out_shape=jax.ShapeDtypeStruct((N, C_out, L), x.dtype),
        grid_spec=pltpu.PrefetchScalarGridSpec(
            num_scalar_prefetch=0,
            grid=(N,),
            in_specs=[
                pl.BlockSpec((1, C_in, L), lambda n: (n, 0, 0)),
                pl.BlockSpec((C_out, 3 * C_in), lambda n: (0, 0)),
                pl.BlockSpec((C_out, 1), lambda n: (0, 0)),
            ],
            out_specs=pl.BlockSpec((1, C_out, L), lambda n: (n, 0, 0)),
        ),
        compiler_params=pltpu.CompilerParams(
            dimension_semantics=("parallel",),
            vmem_limit_bytes=64 * 1024 * 1024,
        ),
    )(x, w_eff, b_eff)


def _reference(x, wd, bd, wp, bp):
    """Pure-JAX reference of the PyTorch forward, for verification."""
    N, C_in, L = x.shape
    x_pad = jnp.pad(x, ((0, 0), (0, 0), (1, 1)))
    # depthwise (k=3, pad=1, groups=C_in)
    y = (x_pad[:, :, 0:L] * wd[None, :, 0:1]
         + x_pad[:, :, 1:L + 1] * wd[None, :, 1:2]
         + x_pad[:, :, 2:L + 2] * wd[None, :, 2:3]
         + bd[None, :, None])
    # pointwise (1x1)
    out = jnp.einsum('oc,ncl->nol', wp, y) + bp[None, :, None]
    return out


if __name__ == "__main__":
    N, C_in, C_out, L = 2, 4, 8, 16

    key = jax.random.PRNGKey(0)
    kx, kwd, kbd, kwp, kbp = jax.random.split(key, 5)

    x = jax.random.normal(kx, (N, C_in, L), dtype=jnp.float32)

    # Parameter shapes match nn.Conv1d weights with the kernel dim squeezed:
    #   depth_conv.weight (C_in, 1, 3) -> (C_in, 3), depth_conv.bias (C_in,)
    #   point_conv.weight (C_out, C_in, 1) -> (C_out, C_in), point_conv.bias (C_out,)
    wd = jax.random.normal(kwd, (C_in, 3), dtype=jnp.float32) * 0.5
    bd = jax.random.normal(kbd, (C_in,), dtype=jnp.float32) * 0.1
    wp = jax.random.normal(kwp, (C_out, C_in), dtype=jnp.float32) * 0.5
    bp = jax.random.normal(kbp, (C_out,), dtype=jnp.float32) * 0.1

    out = depthwise_separable_1dconv(x, wd, bd, wp, bp)
    out = jax.block_until_ready(out)

    ref = _reference(x, wd, bd, wp, bp)
    assert out.shape == (N, C_out, L)
    assert jnp.allclose(out, ref, atol=1e-4, rtol=1e-4), (
        float(jnp.max(jnp.abs(out - ref))))

    print("KERNEL_OK")
</pallas_src>

<mosaic_0001>
module attributes {stable_mosaic.version = 11 : i64} {
  func.func @_dsconv_kernel(%arg0: i32, %arg1: memref<1x4x16xf32, #tpu.memory_space<vmem>>, %arg2: memref<8x12xf32, #tpu.memory_space<vmem>>, %arg3: memref<8x1xf32, #tpu.memory_space<vmem>>, %arg4: memref<1x8x16xf32, #tpu.memory_space<vmem>>) attributes {dimension_semantics = [#tpu.dimension_semantics<parallel>], iteration_bounds = array<i64: 2>, scalar_prefetch = 0 : i64, scratch_operands = 0 : i64, tpu.core_type = #tpu.core_type<tc>, window_params = [{transform_indices = @transform_0, window_bounds = array<i64: 1, 4, 16>}, {pipeline_mode = #tpu.pipeline_mode<synchronous>, transform_indices = @transform_1, window_bounds = array<i64: 8, 12>}, {pipeline_mode = #tpu.pipeline_mode<synchronous>, transform_indices = @transform_2, window_bounds = array<i64: 8, 1>}, {transform_indices = @transform_3, window_bounds = array<i64: 1, 8, 16>}]} {
    %c0 = arith.constant 0 : index
    %c0_0 = arith.constant 0 : index
    %c0_1 = arith.constant 0 : index
    %0 = vector.load %arg1[%c0, %c0_0, %c0_1] : memref<1x4x16xf32, #tpu.memory_space<vmem>>, vector<1x4x16xf32>
    %1 = vector.shape_cast %0 : vector<1x4x16xf32> to vector<4x16xf32>
    %2 = tpu.iota {dimensions = array<i32: 1>} : vector<4x16xi32>
    %cst = arith.constant 0.000000e+00 : f32
    %3 = vector.broadcast %cst : f32 to vector<4x16xf32>
    %c0_i32 = arith.constant 0 : i32
    %4 = vector.broadcast %c0_i32 : i32 to vector<4x16xi32>
    %5 = arith.cmpi eq, %2, %4 : vector<4x16xi32>
    %c1_i32 = arith.constant 1 : i32
    %6 = tpu.dynamic_rotate %1 by %c1_i32 dim 1 : vector<4x16xf32>, i32 -> vector<4x16xf32>
    %7 = arith.select %5, %3, %6 : vector<4x16xi1>, vector<4x16xf32>
    %c15_i32 = arith.constant 15 : i32
    %8 = vector.broadcast %c15_i32 : i32 to vector<4x16xi32>
    %9 = arith.cmpi eq, %2, %8 : vector<4x16xi32>
    %c15_i32_2 = arith.constant 15 : i32
    %10 = tpu.dynamic_rotate %1 by %c15_i32_2 dim 1 : vector<4x16xf32>, i32 -> vector<4x16xf32>
    %11 = arith.select %9, %3, %10 : vector<4x16xi1>, vector<4x16xf32>
    %12 = tpu.concatenate %7, %1, %11 in 0 : vector<4x16xf32>, vector<4x16xf32>, vector<4x16xf32> -> vector<12x16xf32>
    %c0_3 = arith.constant 0 : index
    %c0_4 = arith.constant 0 : index
    %13 = vector.load %arg2[%c0_3, %c0_4] : memref<8x12xf32, #tpu.memory_space<vmem>>, vector<8x12xf32>
    %cst_5 = arith.constant dense<0.000000e+00> : vector<8x16xf32>
    %14 = tpu.matmul %13, %12, %cst_5 {dimension_numbers = #tpu.dot_dimension_numbers<[1], [0], [0], [1], [0, 0, 1, 1], [], []>} : vector<8x12xf32>, vector<12x16xf32>, vector<8x16xf32> -> vector<8x16xf32>
    %c0_6 = arith.constant 0 : index
    %c0_7 = arith.constant 0 : index
    %15 = vector.load %arg3[%c0_6, %c0_7] : memref<8x1xf32, #tpu.memory_space<vmem>>, vector<8x1xf32>
    %16 = vector.broadcast %15 : vector<8x1xf32> to vector<8x16xf32>
    %17 = arith.addf %14, %16 : vector<8x16xf32>
    %c0_8 = arith.constant 0 : index
    %c0_9 = arith.constant 0 : index
    %c0_10 = arith.constant 0 : index
    %18 = vector.load %arg4[%c0_8, %c0_9, %c0_10] : memref<1x8x16xf32, #tpu.memory_space<vmem>>, vector<1x8x16xf32>
    %19 = vector.shape_cast %18 : vector<1x8x16xf32> to vector<8x16xf32>
    %20 = vector.shape_cast %17 : vector<8x16xf32> to vector<1x8x16xf32>
    tpu.vector_store %arg4[%c0_8, %c0_9, %c0_10], %20 {strides = array<i32>} : memref<1x8x16xf32, #tpu.memory_space<vmem>>, vector<1x8x16xf32>,
    return
  }
  func.func @transform_0(%arg0: i32) -> (i32, i32, i32) {
    %c0_i32 = arith.constant 0 : i32
    %c0_i32_0 = arith.constant 0 : i32
    %c0_i32_1 = arith.constant 0 : i32
    return %arg0, %c0_i32, %c0_i32_0 : i32, i32, i32
  }
  func.func @transform_1(%arg0: i32) -> (i32, i32) {
    %c0_i32 = arith.constant 0 : i32
    %c0_i32_0 = arith.constant 0 : i32
    %c0_i32_1 = arith.constant 0 : i32
    return %c0_i32, %c0_i32_0 : i32, i32
  }
  func.func @transform_2(%arg0: i32) -> (i32, i32) {
    %c0_i32 = arith.constant 0 : i32
    %c0_i32_0 = arith.constant 0 : i32
    %c0_i32_1 = arith.constant 0 : i32
    return %c0_i32, %c0_i32_0 : i32, i32
  }
  func.func @transform_3(%arg0: i32) -> (i32, i32, i32) {
    %c0_i32 = arith.constant 0 : i32
    %c0_i32_0 = arith.constant 0 : i32
    %c0_i32_1 = arith.constant 0 : i32
    return %arg0, %c0_i32, %c0_i32_0 : i32, i32, i32
  }
}

</mosaic_0001>

<bundles_post_ra>
// kernel: tpu_custom_call.1
= control target key start
LH: loop header
LB: loop body
LE: loop exit
PB: predicated region body
PF: predicated region fallthrough
CT: control target
= control target key end

     0   :  { %8 = vsyncpa [#allocation3], 0  ;;  %s615_s0 = inlined_call_operand.vmem [shape: f32[2,4,16], index: 0, kind: input, shape index: {}]   ;;  %s616_s1 = inlined_call_operand.hbm [shape: f32[8,12], index: 1, kind: input, shape index: {}]   ;;  %s617_s2 = inlined_call_operand.vmem [shape: f32[8,1], index: 2, kind: input, shape index: {}]   ;;  %s618_s3 = inlined_call_operand.hbm [shape: f32[2,8,16], index: 3, kind: output, shape index: {}]  }
   0x1   :  { %9 = vsyncpa [#allocation4], 0 }
   0x2   :  { %11 = vsyncpa [#allocation4 + $0x1], 0  ;;  %s523_s12 = smov 0   ;;  %s525_s13 = smov 0  }
   0x3   :  { %s527_s14 = smov 0   ;;  %s529_s15 = smov 0  }
   0x4 LB: > { %s544_s16 = sadd.s32 4294967295, %s496_s15   ;;  %s330_s17 = sadd.s32 4294967294, %s496_s15   ;;  %s496_s15 = sphi %s529_s15, %s624_s15   ;;  %s492_s14 = sphi %s527_s14, %s623_s14   ;;  %s488_s13 = sphi %s525_s13, %s622_s13   ;;  %s484_s12 = sphi %s523_s12, %s621_s12  }
   0x5   : > { %s548_s18 = sadd.s32 1, %s496_s15   ;;  %s92_s19 = sadd.s32 1, %s492_s14 }
   0x6   : > { %s89_s20 = ssub.s32 %s496_s15, %s548_s18  ;;  %p102_p0 = scmp.ne.s32.totalorder %s492_s14, %s488_s13 }
   0x7   : > { %p90_p1 = scmp.eq.s32.totalorder %s89_s20, 0  ;;  %p103_p2 = scmp.eq.s32.totalorder %s544_s16, 1 }
   0x8   : > { %p108_p3 = scmp.ne.s32.totalorder %s488_s13, %s484_s12  ;;  %p109_p4 = scmp.eq.s32.totalorder %s330_s17, 1 }
   0x9   : > { %s559_s21 = scalar_select %p90_p1, %s492_s14, %s92_s19  }
   0xa   : > { %p561_p5 = por %p103_p2, %p102_p0  ;;  %p565_p6 = por %p109_p4, %p108_p3 }
   0xb   : > { %p331_p7 = scmp.ge.s32.totalorder %s496_s15, 1  ;;  %p116_p8 = scmp.lt.s32.totalorder %s496_s15, 3 }
   0xc   : > { %p358_p9 = scmp.eq.s32.totalorder %s544_s16, 0  ;;  %s128_s26 = sshll.u32 %s616_s1, 4  ;;  %s129_s26 = int_to_ptr.hbm [resolvable:$true] %s128_s26 }
   0xd   : > { %p117_p10 = pnand %p331_p7, %p116_p8  ;;  %s498_s27 = smov [#allocation2]  }
   0xe   : > { %s130_s28 = sshll.u32 %s498_s27, 4  ;;  %s131_s28 = int_to_ptr.vmem [resolvable:$true] %s130_s28 }
   0xf   : > { %p350_p11 = pneg %p117_p10  ;;  %153 = sbr.rel (%p117_p10) target bundleno = 517 (0x205), region = 32 }
  0x11   : > { %p351_p12 = pnand %p358_p9, %p350_p11 }
  0x13   : > { %353 = dma.hbm_to_vmem [thread:$0]  (!%p351_p12), %s129_s26, 128, %s131_s28, [#allocation3]  }
  0x14   : > { %475 = dma.done.wait (%p358_p9), [#allocation3], 128  }
  0x15   : > { %477 = vsyncadd (%p358_p9), [#allocation3], 4294967168  ;;  %p177_p13 = scmp.lt.s32.totalorder %s544_s16, 1  ;;  %s499_s7 = smov 16   ;;  %vm185_vm0 = vcmask 1047680   ;;  %v208_v5 = vld [vmem:[%s617_s2] sm:$0xff]  ;;  %v182_v7 = vlaneseq }
  0x16   : > { %s500_s8 = smov 127   ;;  %s501_s9 = smov 113   ;;  %v502_v6 = vmov 0   ;;  %vm205_vm2 = vcmask 1043456   ;;  %v207_v14 = vld [vmem:[#allocation2] sm:$0xff]  ;;  %vm214_vm4 = vcmask 97280  }
  0x17   : > { %s178_s29 = scalar_select %p177_p13, %s544_s16, 1  ;;  %398 = vset.pattern.permute.xlu2 %v502_v6  ;;  %399 = vset.pattern.permute.xlu0 %v502_v6  ;;  %v183_v8 = vand.u32 127, %v182_v7  ;;  %vm241_vm5 = vcmask 130048  }
  0x18   : > { %211 = vperm.xlu2 %398, %v208_v5   ;;  %s174_s17 = sand.u32 1, %s488_s13   ;;  %s341_s20 = sshll.u32 %s544_s16, 3 }
  0x19   : > { %s337_s30 = sshll.u32 %s178_s29, 2  ;;  %vm197_vm1 = vcmp.eq.s32.totalorder %v183_v8, 15  ;;  %vm184_vm3 = vcmp.eq.s32.totalorder %v183_v8, 0  ;;  %s336_s19 = sshll.u32 %s174_s17, 3 }
  0x1a   : > { %s180_s6 = scalar_lea.vmem %s615_s0, %s337_s30  ;;  %s254_s26 = scalar_lea.hbm %s618_s3, %s341_s20 }
  0x1b   : > { %v181_v0 = vld [vmem:[%s180_s6] sm:$0xf]  ;;  %s176_s27 = scalar_lea.vmem [#allocation5], %s336_s19  ;;  %s258_s29 = sshll.u32 %s254_s26, 4  ;;  %s259_s29 = int_to_ptr.hbm [resolvable:$true] %s258_s29 }
  0x1c   : > { %186 = vrot.lane.b32.xlu0 %v181_v0, %s499_s7  ;;  %v203_v11 = vrot.slane %v181_v0, 4  ;;  %s256_s28 = sshll.u32 %s176_s27, 4  ;;  %s244_s30 = scalar_lea.sflag [#allocation4], %s174_s17  ;;  %s257_s28 = int_to_ptr.vmem [resolvable:$true] %s256_s28 }
  0x1d   : > { %s444_s4 = sshra.s32 %s259_s29, 4  ;;  %s445_s4 = int_to_ptr.hbm [resolvable:$true] %s444_s4 }
  0x1e   : > { %s446_s5 = scalar_lea.hbm %s445_s4, 8  ;;  %p451_p3 = scmp.lt.s32.totalorder %s445_s4, %s618_s3 }
  0x1f   : > { %p447_p0 = scmp.ne.s32.totalorder %s445_s4, %s446_s5 }
  0x21   : > { %p448_p1 = pnand %p447_p0, %p561_p5 }
  0x23   : > { %p449_p2 = pneg %p448_p1 }
  0x72   : > { %v212_v16 = vpop.permute.xlu2 %211 }
  0x8e   : > { %v187_v1 = vpop.permute.xlu0 %186 }
  0x8f   : > { %v188_v2 = vsel %vm185_vm0, %v187_v1, %v181_v0 }
  0x90   : > { %189 = vrot.lane.b32.xlu0 %v188_v2, %s499_s7  ;;  %s450_s7 = scalar_lea.hbm %s618_s3, 16 }
  0x91   : > { %p452_p4 = scmp.lt.s32.totalorder %s450_s7, %s446_s5 }
  0x93   : > { %p453_p7 = por %p452_p4, %p451_p3 }
  0x95   : > { %p454_p8 = pnand %p453_p7, %p449_p2 }
 0x102   : > { %v190_v3 = vpop.permute.xlu0 %189 }
 0x103   : > { %v191_v4 = vsel %vm185_vm0, %v190_v3, %v181_v0 }
 0x104   : > { %198 = vrot.lane.b32.xlu1 %v191_v4, %s500_s8 }
 0x10c   : > { %193 = vrot.lane.b32.xlu1 %v191_v4, %s501_s9 }
 0x176   : > { %v199_v9 = vpop.permute.xlu1 %198 }
 0x177   : > { %v201_v10 = vsel %vm197_vm1, 0.0, %v199_v9 }
 0x178   : > { %338 = vmatpush.msk.msra.mxu0 %vm205_vm2, %v201_v10 }
 0x17e   : > { %v194_v12 = vpop.permute.xlu1 %193 }
 0x17f   : > { %v196_v13 = vsel %vm184_vm3, 0.0, %v194_v12 }
 0x180   : > { %v206_v15 = vsel %vm205_vm2, %v196_v13, %v203_v11 }
 0x181   : > { %236 = vmatpush.msra.mxu0 %v206_v15 }
 0x182   : > { %339 = vmatmul.msk.f32.vlgmr.msra.gmra.mxu0 %vm214_vm4, %v207_v14 }
 0x1ff   : > { %v238_v17 = vpop.f32.mrf.mxu0 }
 0x200   : > { %v239_v18 = vadd.f32 %v238_v17, %v212_v16 }
 0x202   : > { %242 = vst.msk [vmem:[%s176_s27] sm:$0xff] %vm241_vm5, %v239_v18 }
 0x203   : > { %457 = shalt.err (!%p454_p8)
}
 0x204   : > { %348 = dma.vmem_to_hbm [thread:$0]  (%p561_p5), %s257_s28, 128, %s259_s29, %s244_s30  }
 0x205 PF: > { %p360_p9 = scmp.ge.s32.totalorder %s496_s15, 2  ;;  %s270_s10 = sand.u32 1, %s484_s12  }
 0x206   : > { %s271_s11 = scalar_lea.sflag [#allocation4], %s270_s10 }
 0x207   : > { %p355_p10 = pnand %p360_p9, %p565_p6 }
 0x209   : > { %p356_p11 = pneg %p355_p10 }
 0x20b   : > { %479 = dma.done.wait (%p356_p11), %s271_s11, 128  }
 0x20c   : > { %481 = vsyncadd (%p356_p11), %s271_s11, 4294967168  ;;  %p14_p12 = scmp.ge.s32.totalorder %s548_s18, 4   ;;  %s621_s12 = smov %s488_s13 }
 0x20d   : > { %s622_s13 = smov %s492_s14  ;;  %s623_s14 = smov %s559_s21 }
 0x20e   : > { %s624_s15 = smov %s548_s18  ;;  %16 = sbr.rel (!%p14_p12) target bundleno = 4 (0x4), region = 72 }
 0x213   :  { %277 = vsyncpa [#allocation3], 1 }
 0x214   :  { %279 = vsyncpa [#allocation3 + $0x1], 1 }
 0x215   :  { %280 = vsyncpa [#allocation4], 1 }
 0x216   :  { %282 = vsyncpa [#allocation4 + $0x1], 1 }

</bundles_post_ra>
